<compile_context>
chip_gen: v7x
topology: tpu7x:2x2x1
jax: 0.10.0
libtpu: 0.0.40
codegen_flags: <defaults>
</compile_context>

<pallas_src>
import jax
import jax.numpy as jnp
from jax.experimental import pallas as pl
from jax.experimental.pallas import tpu as pltpu


def _round_up(x, k):
    return ((x + k - 1) // k) * k


def deeponet_kernel(
    ux_ref,        # (B_p, m_p)      bf16   branch input
    bw1_ref,       # (m_p, hid_p)    bf16   branch Linear 1 weight (in, out)
    bb1_ref,       # (1, hid_p)      f32
    bw2_ref,       # (hid_p, p_p)    bf16   branch Linear 2 weight (in, out)
    bb2_ref,       # (1, p_p)        f32
    yrow_ref,      # (1, TILE_M)     f32    y_loc transposed, current M tile
    tw1_ref,       # (hid_p, 1)      f32    trunk Linear(1, hidden) weight (column)
    tb1_ref,       # (hid_p, 1)      f32
    tw2t_ref,      # (p_p, hid_p)    bf16   trunk Linear(hidden, p) weight, transposed
    tb2_ref,       # (p_p, 1)        f32
    b0_ref,        # (1, 1)          f32    scalar bias (SMEM)
    out_ref,       # (B_p, TILE_M)   f32
    branch_ref,    # (B_p, p_p)      bf16   VMEM scratch: cached branch output
):
    f32 = jnp.float32
    bf16 = jnp.bfloat16

    # ---- branch net: Linear(m, h) -> ReLU -> Linear(h, p)  (MXU, bf16/f32 acc)
    # Depends only on ux, not on the M tile -> compute once, cache in scratch.
    @pl.when(pl.program_id(0) == 0)
    def _():
        h_b = jnp.dot(ux_ref[...], bw1_ref[...],
                      preferred_element_type=f32) + bb1_ref[...]
        h_b = jnp.maximum(h_b, 0.0)
        br = jnp.dot(h_b.astype(bf16), bw2_ref[...],
                     preferred_element_type=f32) + bb2_ref[...]       # (B_p, p_p)
        branch_ref[...] = br.astype(bf16)

    # ---- trunk net for this M tile (transposed layout).
    # Layer 1 has contraction dim == 1 -> rank-1 broadcast multiply-add on the
    # VPU: (hid_p, 1) * (1, TILE_M) + (hid_p, 1) -> (hid_p, TILE_M).
    h_t = jnp.maximum(tw1_ref[...] * yrow_ref[...] + tb1_ref[...], 0.0)
    trunk = jnp.dot(tw2t_ref[...], h_t.astype(bf16),
                    preferred_element_type=f32) + tb2_ref[...]
    trunk = jnp.maximum(trunk, 0.0)                                    # (p_p, TILE_M)

    # ---- G_uy = branch @ trunk + b   (M stays on the lane axis; no transpose)
    g = jnp.dot(branch_ref[...], trunk.astype(bf16),
                preferred_element_type=f32)
    out_ref[...] = g + b0_ref[0, 0]


def deeponet_forward(ux, y_loc, params, *, max_tile_m=512):
    B, m = ux.shape
    M = y_loc.shape[0]
    hidden = params["bw1"].shape[1]
    p = params["bw2"].shape[1]

    f32 = jnp.float32
    bf16 = jnp.bfloat16

    # ---- lane/sublane aligned padded sizes --------------------------------
    B_p = _round_up(B, 8)
    m_p = _round_up(m, 128)
    hid_p = _round_up(hidden, 128)
    p_p = _round_up(p, 128)
    tile_m = min(max_tile_m, _round_up(M, 128))   # demo shapes -> single step
    M_p = _round_up(M, tile_m)

    # ---- zero-pad + re-layout + cast (one-time plumbing, outside the kernel)
    ux_p = jnp.pad(ux.astype(f32), ((0, B_p - B), (0, m_p - m))).astype(bf16)
    yrow = jnp.pad(y_loc.astype(f32).reshape(1, M), ((0, 0), (0, M_p - M)))

    bw1 = jnp.pad(params["bw1"], ((0, m_p - m), (0, hid_p - hidden))).astype(bf16)
    bb1 = jnp.pad(params["bb1"].reshape(1, hidden), ((0, 0), (0, hid_p - hidden)))
    bw2 = jnp.pad(params["bw2"], ((0, hid_p - hidden), (0, p_p - p))).astype(bf16)
    bb2 = jnp.pad(params["bb2"].reshape(1, p), ((0, 0), (0, p_p - p)))

    tw1 = jnp.pad(params["tw1"].reshape(hidden, 1), ((0, hid_p - hidden), (0, 0)))
    tb1 = jnp.pad(params["tb1"].reshape(hidden, 1), ((0, hid_p - hidden), (0, 0)))
    tw2t = jnp.pad(params["tw2"].T, ((0, p_p - p), (0, hid_p - hidden))).astype(bf16)
    tb2 = jnp.pad(params["tb2"].reshape(p, 1), ((0, p_p - p), (0, 0)))
    b0 = params["b0"].reshape(1, 1).astype(f32)

    # resident (DMA'd once) full-array blocks: constant index_map
    def full(shape):
        return pl.BlockSpec(shape, lambda i: (0, 0))

    grid = (M_p // tile_m,)

    out_p = pl.pallas_call(
        deeponet_kernel,
        out_shape=jax.ShapeDtypeStruct((B_p, M_p), jnp.float32),
        grid=grid,
        in_specs=[
            full((B_p, m_p)),                                   # ux
            full((m_p, hid_p)),                                 # bw1
            full((1, hid_p)),                                   # bb1
            full((hid_p, p_p)),                                 # bw2
            full((1, p_p)),                                     # bb2
            pl.BlockSpec((1, tile_m), lambda i: (0, i)),        # y row (M tile)
            full((hid_p, 1)),                                   # tw1
            full((hid_p, 1)),                                   # tb1
            full((p_p, hid_p)),                                 # tw2^T
            full((p_p, 1)),                                     # tb2
            pl.BlockSpec(memory_space=pltpu.MemorySpace.SMEM),  # scalar b
        ],
        out_specs=pl.BlockSpec((B_p, tile_m), lambda i: (0, i)),
        scratch_shapes=[pltpu.VMEM((B_p, p_p), bf16)],          # cached branch out
        compiler_params=pltpu.CompilerParams(
            # "arbitrary": branch scratch is written on step 0 and reused on
            # later M tiles, so the grid must run sequentially on one core.
            dimension_semantics=("arbitrary",),
            vmem_limit_bytes=32 * 1024 * 1024,
        ),
    )(ux_p, bw1, bb1, bw2, bb2, yrow, tw1, tb1, tw2t, tb2, b0)

    return out_p[:B, :M]


def init_params(key, m, p, hidden_dim):
    """Deterministic init. Linear weights stored as (in_features, out_features)."""
    ks = jax.random.split(key, 9)

    def lin(kw, kb, fan_in, fan_out):
        std = (2.0 / (fan_in + fan_out)) ** 0.5   # xavier-normal-like
        w = jax.random.normal(kw, (fan_in, fan_out), jnp.float32) * std
        b = 0.1 * jax.random.normal(kb, (fan_out,), jnp.float32)
        return w, b

    bw1, bb1 = lin(ks[0], ks[1], m, hidden_dim)
    bw2, bb2 = lin(ks[2], ks[3], hidden_dim, p)
    tw1, tb1 = lin(ks[4], ks[5], 1, hidden_dim)
    tw2, tb2 = lin(ks[6], ks[7], hidden_dim, p)
    b0 = jax.random.normal(ks[8], (1,), jnp.float32)   # nn.Parameter(torch.randn(1))
    return dict(bw1=bw1, bb1=bb1, bw2=bw2, bb2=bb2,
                tw1=tw1, tb1=tb1, tw2=tw2, tb2=tb2, b0=b0)


def deeponet_reference(ux, y_loc, params, *, match_kernel_precision=False):
    """Pure-JAX reference of the PyTorch forward.

    match_kernel_precision=True applies the same bf16 matmul-operand casts
    (f32 accumulation) that the kernel uses, for a tight numerical check.
    """
    f32 = jnp.float32
    cast = (lambda x: x.astype(jnp.bfloat16)) if match_kernel_precision else (lambda x: x)

    h_b = jnp.maximum(
        jnp.dot(cast(ux), cast(params["bw1"]), preferred_element_type=f32)
        + params["bb1"], 0.0)
    branch = jnp.dot(cast(h_b), cast(params["bw2"]),
                     preferred_element_type=f32) + params["bb2"]

    h_t = jnp.maximum(y_loc @ params["tw1"] + params["tb1"], 0.0)     # layer 1 stays f32
    trunk = jnp.maximum(
        jnp.dot(cast(h_t), cast(params["tw2"]), preferred_element_type=f32)
        + params["tb2"], 0.0)

    g = jnp.dot(cast(branch), cast(trunk).T, preferred_element_type=f32)
    return g + params["b0"][0]


if __name__ == "__main__":
    # Shapes from the PyTorch demo: m=150 sensors, 150 query locations,
    # hidden_dim=128, p=32, batch=50.
    m, n_yloc, hidden, p, batch = 150, 150, 128, 32, 50

    key = jax.random.PRNGKey(0)
    k_ux, k_par = jax.random.split(key)

    ux = jax.random.normal(k_ux, (batch, m), jnp.float32)
    y_loc = jnp.linspace(-2.0, 2.0, n_yloc, dtype=jnp.float32).reshape(n_yloc, 1)
    params = init_params(k_par, m, p, hidden)

    out = jax.jit(deeponet_forward)(ux, y_loc, params)
    out = jax.block_until_ready(out)
    assert out.shape == (batch, n_yloc)

    # Tight check against a precision-matched (bf16 matmul / f32 acc) reference.
    ref_matched = deeponet_reference(ux, y_loc, params, match_kernel_precision=True)
    assert jnp.allclose(out, ref_matched, atol=5e-3, rtol=5e-3), \
        "mismatch vs precision-matched reference"

    # Looser sanity check against the exact f32 PyTorch-semantics reference
    # (difference is only bf16 matmul rounding).
    ref_f32 = deeponet_reference(ux, y_loc, params, match_kernel_precision=False)
    assert jnp.allclose(out, ref_f32, atol=1e-1, rtol=1e-1), \
        "mismatch vs f32 reference beyond bf16 tolerance"

    print("KERNEL_OK")
</pallas_src>

<mosaic_0001>
module attributes {stable_mosaic.version = 11 : i64} {
  func.func @deeponet_kernel(%arg0: i32, %arg1: memref<56x256xbf16, #tpu.memory_space<vmem>>, %arg2: memref<256x128xbf16, #tpu.memory_space<vmem>>, %arg3: memref<1x128xf32, #tpu.memory_space<vmem>>, %arg4: memref<128x128xbf16, #tpu.memory_space<vmem>>, %arg5: memref<1x128xf32, #tpu.memory_space<vmem>>, %arg6: memref<1x256xf32, #tpu.memory_space<vmem>>, %arg7: memref<128x1xf32, #tpu.memory_space<vmem>>, %arg8: memref<128x1xf32, #tpu.memory_space<vmem>>, %arg9: memref<128x128xbf16, #tpu.memory_space<vmem>>, %arg10: memref<128x1xf32, #tpu.memory_space<vmem>>, %arg11: memref<1x1xf32, #tpu.memory_space<smem>>, %arg12: memref<56x256xf32, #tpu.memory_space<vmem>>, %arg13: memref<56x128xbf16, #tpu.memory_space<vmem>>) attributes {dimension_semantics = [#tpu.dimension_semantics<arbitrary>], iteration_bounds = array<i64: 1>, scalar_prefetch = 0 : i64, scratch_operands = 1 : i64, tpu.core_type = #tpu.core_type<tc>, window_params = [{pipeline_mode = #tpu.pipeline_mode<synchronous>, transform_indices = @transform_0, window_bounds = array<i64: 56, 256>}, {pipeline_mode = #tpu.pipeline_mode<synchronous>, transform_indices = @transform_1, window_bounds = array<i64: 256, 128>}, {pipeline_mode = #tpu.pipeline_mode<synchronous>, transform_indices = @transform_2, window_bounds = array<i64: 1, 128>}, {pipeline_mode = #tpu.pipeline_mode<synchronous>, transform_indices = @transform_3, window_bounds = array<i64: 128, 128>}, {pipeline_mode = #tpu.pipeline_mode<synchronous>, transform_indices = @transform_4, window_bounds = array<i64: 1, 128>}, {transform_indices = @transform_5, window_bounds = array<i64: 1, 256>}, {pipeline_mode = #tpu.pipeline_mode<synchronous>, transform_indices = @transform_6, window_bounds = array<i64: 128, 1>}, {pipeline_mode = #tpu.pipeline_mode<synchronous>, transform_indices = @transform_7, window_bounds = array<i64: 128, 1>}, {pipeline_mode = #tpu.pipeline_mode<synchronous>, transform_indices = @transform_8, window_bounds = array<i64: 128, 128>}, {pipeline_mode = #tpu.pipeline_mode<synchronous>, transform_indices = @transform_9, window_bounds = array<i64: 128, 1>}, {transform_indices = @transform_10, window_bounds = array<i64: 1, 1>}, {transform_indices = @transform_11, window_bounds = array<i64: 56, 256>}]} {
    %c0_i32 = arith.constant 0 : i32
    %0 = arith.cmpi eq, %arg0, %c0_i32 : i32
    %1 = arith.extui %0 : i1 to i32
    %c0_i32_0 = arith.constant 0 : i32
    %2 = arith.cmpi ne, %1, %c0_i32_0 : i32
    scf.if %2 {
      %c0_19 = arith.constant 0 : index
      %c0_20 = arith.constant 0 : index
      %28 = vector.load %arg1[%c0_19, %c0_20] : memref<56x256xbf16, #tpu.memory_space<vmem>>, vector<56x256xbf16>
      %c0_21 = arith.constant 0 : index
      %c0_22 = arith.constant 0 : index
      %29 = vector.load %arg2[%c0_21, %c0_22] : memref<256x128xbf16, #tpu.memory_space<vmem>>, vector<256x128xbf16>
      %cst_23 = arith.constant dense<0.000000e+00> : vector<56x128xf32>
      %30 = tpu.matmul %28, %29, %cst_23 {dimension_numbers = #tpu.dot_dimension_numbers<[1], [0], [0], [1], [0, 0, 1, 1], [], []>} : vector<56x256xbf16>, vector<256x128xbf16>, vector<56x128xf32> -> vector<56x128xf32>
      %c0_24 = arith.constant 0 : index
      %c0_25 = arith.constant 0 : index
      %31 = vector.load %arg3[%c0_24, %c0_25] : memref<1x128xf32, #tpu.memory_space<vmem>>, vector<1x128xf32>
      %32 = vector.broadcast %31 : vector<1x128xf32> to vector<56x128xf32>
      %33 = arith.addf %30, %32 : vector<56x128xf32>
      %cst_26 = arith.constant 0.000000e+00 : f32
      %34 = vector.broadcast %cst_26 : f32 to vector<56x128xf32>
      %35 = arith.maximumf %33, %34 : vector<56x128xf32>
      %36 = arith.truncf %35 : vector<56x128xf32> to vector<56x128xbf16>
      %c0_27 = arith.constant 0 : index
      %c0_28 = arith.constant 0 : index
      %37 = vector.load %arg4[%c0_27, %c0_28] : memref<128x128xbf16, #tpu.memory_space<vmem>>, vector<128x128xbf16>
      %cst_29 = arith.constant dense<0.000000e+00> : vector<56x128xf32>
      %38 = tpu.matmul %36, %37, %cst_29 {dimension_numbers = #tpu.dot_dimension_numbers<[1], [0], [0], [1], [0, 0, 1, 1], [], []>} : vector<56x128xbf16>, vector<128x128xbf16>, vector<56x128xf32> -> vector<56x128xf32>
      %c0_30 = arith.constant 0 : index
      %c0_31 = arith.constant 0 : index
      %39 = vector.load %arg5[%c0_30, %c0_31] : memref<1x128xf32, #tpu.memory_space<vmem>>, vector<1x128xf32>
      %40 = vector.broadcast %39 : vector<1x128xf32> to vector<56x128xf32>
      %41 = arith.addf %38, %40 : vector<56x128xf32>
      %42 = arith.truncf %41 : vector<56x128xf32> to vector<56x128xbf16>
      %c0_32 = arith.constant 0 : index
      %c0_33 = arith.constant 0 : index
      %43 = vector.load %arg13[%c0_32, %c0_33] : memref<56x128xbf16, #tpu.memory_space<vmem>>, vector<56x128xbf16>
      tpu.vector_store %arg13[%c0_32, %c0_33], %42 {strides = array<i32>} : memref<56x128xbf16, #tpu.memory_space<vmem>>, vector<56x128xbf16>,
    } else {
    }
    %c0 = arith.constant 0 : index
    %c0_1 = arith.constant 0 : index
    %3 = vector.load %arg7[%c0, %c0_1] : memref<128x1xf32, #tpu.memory_space<vmem>>, vector<128x1xf32>
    %c0_2 = arith.constant 0 : index
    %c0_3 = arith.constant 0 : index
    %4 = vector.load %arg6[%c0_2, %c0_3] : memref<1x256xf32, #tpu.memory_space<vmem>>, vector<1x256xf32>
    %5 = vector.broadcast %3 : vector<128x1xf32> to vector<128x256xf32>
    %6 = vector.broadcast %4 : vector<1x256xf32> to vector<128x256xf32>
    %7 = arith.mulf %5, %6 : vector<128x256xf32>
    %c0_4 = arith.constant 0 : index
    %c0_5 = arith.constant 0 : index
    %8 = vector.load %arg8[%c0_4, %c0_5] : memref<128x1xf32, #tpu.memory_space<vmem>>, vector<128x1xf32>
    %9 = vector.broadcast %8 : vector<128x1xf32> to vector<128x256xf32>
    %10 = arith.addf %7, %9 : vector<128x256xf32>
    %cst = arith.constant 0.000000e+00 : f32
    %11 = vector.broadcast %cst : f32 to vector<128x256xf32>
    %12 = arith.maximumf %10, %11 : vector<128x256xf32>
    %c0_6 = arith.constant 0 : index
    %c0_7 = arith.constant 0 : index
    %13 = vector.load %arg9[%c0_6, %c0_7] : memref<128x128xbf16, #tpu.memory_space<vmem>>, vector<128x128xbf16>
    %14 = arith.truncf %12 : vector<128x256xf32> to vector<128x256xbf16>
    %cst_8 = arith.constant dense<0.000000e+00> : vector<128x256xf32>
    %15 = tpu.matmul %13, %14, %cst_8 {dimension_numbers = #tpu.dot_dimension_numbers<[1], [0], [0], [1], [0, 0, 1, 1], [], []>} : vector<128x128xbf16>, vector<128x256xbf16>, vector<128x256xf32> -> vector<128x256xf32>
    %c0_9 = arith.constant 0 : index
    %c0_10 = arith.constant 0 : index
    %16 = vector.load %arg10[%c0_9, %c0_10] : memref<128x1xf32, #tpu.memory_space<vmem>>, vector<128x1xf32>
    %17 = vector.broadcast %16 : vector<128x1xf32> to vector<128x256xf32>
    %18 = arith.addf %15, %17 : vector<128x256xf32>
    %cst_11 = arith.constant 0.000000e+00 : f32
    %19 = vector.broadcast %cst_11 : f32 to vector<128x256xf32>
    %20 = arith.maximumf %18, %19 : vector<128x256xf32>
    %c0_12 = arith.constant 0 : index
    %c0_13 = arith.constant 0 : index
    %21 = vector.load %arg13[%c0_12, %c0_13] : memref<56x128xbf16, #tpu.memory_space<vmem>>, vector<56x128xbf16>
    %22 = arith.truncf %20 : vector<128x256xf32> to vector<128x256xbf16>
    %cst_14 = arith.constant dense<0.000000e+00> : vector<56x256xf32>
    %23 = tpu.matmul %21, %22, %cst_14 {dimension_numbers = #tpu.dot_dimension_numbers<[1], [0], [0], [1], [0, 0, 1, 1], [], []>} : vector<56x128xbf16>, vector<128x256xbf16>, vector<56x256xf32> -> vector<56x256xf32>
    %c0_15 = arith.constant 0 : index
    %c0_16 = arith.constant 0 : index
    %24 = memref.load %arg11[%c0_15, %c0_16] : memref<1x1xf32, #tpu.memory_space<smem>>
    %25 = vector.broadcast %24 : f32 to vector<56x256xf32>
    %26 = arith.addf %23, %25 : vector<56x256xf32>
    %c0_17 = arith.constant 0 : index
    %c0_18 = arith.constant 0 : index
    %27 = vector.load %arg12[%c0_17, %c0_18] : memref<56x256xf32, #tpu.memory_space<vmem>>, vector<56x256xf32>
    tpu.vector_store %arg12[%c0_17, %c0_18], %26 {strides = array<i32>} : memref<56x256xf32, #tpu.memory_space<vmem>>, vector<56x256xf32>,
    return
  }
  func.func @transform_0(%arg0: i32) -> (i32, i32) {
    %c0_i32 = arith.constant 0 : i32
    %c0_i32_0 = arith.constant 0 : i32
    %c0_i32_1 = arith.constant 0 : i32
    return %c0_i32, %c0_i32_0 : i32, i32
  }
  func.func @transform_1(%arg0: i32) -> (i32, i32) {
    %c0_i32 = arith.constant 0 : i32
    %c0_i32_0 = arith.constant 0 : i32
    %c0_i32_1 = arith.constant 0 : i32
    return %c0_i32, %c0_i32_0 : i32, i32
  }
  func.func @transform_2(%arg0: i32) -> (i32, i32) {
    %c0_i32 = arith.constant 0 : i32
    %c0_i32_0 = arith.constant 0 : i32
    %c0_i32_1 = arith.constant 0 : i32
    return %c0_i32, %c0_i32_0 : i32, i32
  }
  func.func @transform_3(%arg0: i32) -> (i32, i32) {
    %c0_i32 = arith.constant 0 : i32
    %c0_i32_0 = arith.constant 0 : i32
    %c0_i32_1 = arith.constant 0 : i32
    return %c0_i32, %c0_i32_0 : i32, i32
  }
  func.func @transform_4(%arg0: i32) -> (i32, i32) {
    %c0_i32 = arith.constant 0 : i32
    %c0_i32_0 = arith.constant 0 : i32
    %c0_i32_1 = arith.constant 0 : i32
    return %c0_i32, %c0_i32_0 : i32, i32
  }
  func.func @transform_5(%arg0: i32) -> (i32, i32) {
    %c0_i32 = arith.constant 0 : i32
    %c0_i32_0 = arith.constant 0 : i32
    return %c0_i32, %arg0 : i32, i32
  }
  func.func @transform_6(%arg0: i32) -> (i32, i32) {
    %c0_i32 = arith.constant 0 : i32
    %c0_i32_0 = arith.constant 0 : i32
    %c0_i32_1 = arith.constant 0 : i32
    return %c0_i32, %c0_i32_0 : i32, i32
  }
  func.func @transform_7(%arg0: i32) -> (i32, i32) {
    %c0_i32 = arith.constant 0 : i32
    %c0_i32_0 = arith.constant 0 : i32
    %c0_i32_1 = arith.constant 0 : i32
    return %c0_i32, %c0_i32_0 : i32, i32
  }
  func.func @transform_8(%arg0: i32) -> (i32, i32) {
    %c0_i32 = arith.constant 0 : i32
    %c0_i32_0 = arith.constant 0 : i32
    %c0_i32_1 = arith.constant 0 : i32
    return %c0_i32, %c0_i32_0 : i32, i32
  }
  func.func @transform_9(%arg0: i32) -> (i32, i32) {
    %c0_i32 = arith.constant 0 : i32
    %c0_i32_0 = arith.constant 0 : i32
    %c0_i32_1 = arith.constant 0 : i32
    return %c0_i32, %c0_i32_0 : i32, i32
  }
  func.func @transform_10(%arg0: i32) -> (i32, i32) {
    %c0_i32 = arith.constant 0 : i32
    %c0_i32_0 = arith.constant 0 : i32
    %c0_i32_1 = arith.constant 0 : i32
    return %c0_i32, %c0_i32_0 : i32, i32
  }
  func.func @transform_11(%arg0: i32) -> (i32, i32) {
    %c0_i32 = arith.constant 0 : i32
    %c0_i32_0 = arith.constant 0 : i32
    return %c0_i32, %arg0 : i32, i32
  }
}

</mosaic_0001>

<bundles_post_ra>
// kernel: deeponet_forward.1
= control target key start
LH: loop header
LB: loop body
LE: loop exit
PB: predicated region body
PF: predicated region fallthrough
CT: control target
= control target key end

     0   :  { %v1469_v2 = vmov 0   ;;  %s1868_s0 = inlined_call_operand.vmem [shape: bf16[56,256], index: 0, kind: input, shape index: {}]   ;;  %s1869_s1 = inlined_call_operand.vmem [shape: bf16[256,128], index: 1, kind: input, shape index: {}]   ;;  %s1870_s2 = inlined_call_operand.vmem [shape: f32[1,128], index: 2, kind: input, shape index: {}]   ;;  %s1871_s3 = inlined_call_operand.vmem [shape: bf16[128,128], index: 3, kind: input, shape index: {}]   ;;  %s1872_s4 = inlined_call_operand.vmem [shape: f32[1,128], index: 4, kind: input, shape index: {}]   ;;  %s1873_s5 = inlined_call_operand.vmem [shape: f32[1,256], index: 5, kind: input, shape index: {}]   ;;  %s1874_s6 = inlined_call_operand.vmem [shape: f32[128,1], index: 6, kind: input, shape index: {}]   ;;  %s1875_s7 = inlined_call_operand.vmem [shape: f32[128,1], index: 7, kind: input, shape index: {}]   ;;  %s1876_s8 = inlined_call_operand.vmem [shape: bf16[128,128], index: 8, kind: input, shape index: {}]   ;;  %s1877_s9 = inlined_call_operand.vmem [shape: f32[128,1], index: 9, kind: input, shape index: {}]   ;;  %s1878_s10 = inlined_call_operand.<no memory space> [shape: f32[1,1], index: 10, kind: input, shape index: {}]   ;;  %s1879_s11 = inlined_call_operand.hbm [shape: f32[56,256], index: 11, kind: output, shape index: {}]  }
   0x1   :  { %v610_v0 = vld [vmem:[%s1875_s7] sm:$0xff]  ;;  %1397 = vset.pattern.permute.xlu1 %v1469_v2  ;;  %1396 = vset.pattern.permute.xlu0 %v1469_v2  ;;  %v611_v5 = vld [vmem:[%s1875_s7 + $0x8] sm:$0xff]  ;;  %v473_v9 = vld [vmem:[%s1874_s6 + $0x18] sm:$0xff] }
   0x2   :  { %v470_v1 = vld [vmem:[%s1874_s6] sm:$0xff]  ;;  %628 = vperm.xlu1 %1397, %v610_v0   ;;  %v471_v6 = vld [vmem:[%s1874_s6 + $0x8] sm:$0xff]  ;;  %v1402_v10 = vld [vmem:[%s1869_s1 + $0x50] sm:$0xff]  }
   0x3   :  { %v1398_v3 = vld [vmem:[%s1869_s1 + $0x40] sm:$0xff]   ;;  %489 = vperm.xlu0 %1396, %v470_v1   ;;  %v1400_v7 = vld [vmem:[%s1869_s1 + $0x48] sm:$0xff]   ;;  %v472_v11 = vld [vmem:[%s1874_s6 + $0x10] sm:$0xff] }
   0x4   :  { %v1399_v4 = vld [vmem:[%s1869_s1] sm:$0xff]   ;;  %1316 = vmatprep.subr.bf16.mxu0 %v1398_v3  ;;  %v1401_v8 = vld [vmem:[%s1869_s1 + $0x8] sm:$0xff]   ;;  %v1403_v12 = vld [vmem:[%s1869_s1 + $0x10] sm:$0xff]  }
   0x5   :  { %1317 = vmatpush3.bf16.msra.mxu0 %v1399_v4  ;;  %v1404_v13 = vld [vmem:[%s1869_s1 + $0x58] sm:$0xff]   ;;  %v612_v15 = vld [vmem:[%s1875_s7 + $0x10] sm:$0xff]  ;;  %v1406_v17 = vld [vmem:[%s1869_s1 + $0x60] sm:$0xff]  }
   0x6   :  { %633 = vperm.xlu1 %1397, %v611_v5   ;;  %1318 = vmatprep.subr.bf16.mxu0 %v1400_v7  ;;  %v613_v14 = vld [vmem:[%s1875_s7 + $0x18] sm:$0xff]  ;;  %v475_v18 = vld [vmem:[%s1874_s6 + $0x28] sm:$0xff]  ;;  %v474_v19 = vld [vmem:[%s1874_s6 + $0x20] sm:$0xff] }
   0x7   :  { %494 = vperm.xlu0 %1396, %v471_v6   ;;  %v1405_v16 = vld [vmem:[%s1869_s1 + $0x18] sm:$0xff]   ;;  %v1407_v20 = vld [vmem:[%s1869_s1 + $0x20] sm:$0xff]   ;;  %v1408_v21 = vld [vmem:[%s1869_s1 + $0x68] sm:$0xff]  }
   0x8   :  { %v615_v22 = vld [vmem:[%s1875_s7 + $0x28] sm:$0xff]  ;;  %v614_v23 = vld [vmem:[%s1875_s7 + $0x20] sm:$0xff]  ;;  %v1410_v25 = vld [vmem:[%s1869_s1 + $0x70] sm:$0xff]  }
   0x9   :  { %1319 = vmatpush3.bf16.msra.mxu0 %v1401_v8  ;;  %v1409_v24 = vld [vmem:[%s1869_s1 + $0x28] sm:$0xff]   ;;  %v477_v26 = vld [vmem:[%s1874_s6 + $0x38] sm:$0xff]  ;;  %v476_v27 = vld [vmem:[%s1874_s6 + $0x30] sm:$0xff] }
   0xa   :  { %1320 = vmatprep.subr.bf16.mxu0 %v1402_v10  ;;  %504 = vperm.xlu1 %1397, %v473_v9   ;;  %v1416_v28 = vld [vmem:[%s1868_s0 + $0x4] ss:$8 sps:$4 sm:$0xff]   ;;  %v1411_v29 = vld [vmem:[%s1869_s1 + $0x30] sm:$0xff]   ;;  %v1412_v30 = vld [vmem:[%s1869_s1 + $0x78] sm:$0xff]  }
   0xb   :  { %499 = vperm.xlu0 %1396, %v472_v11   ;;  %256 = vmatprep.mubr.bf16.mxu0 %v1416_v28  ;;  %v617_v31 = vld [vmem:[%s1875_s7 + $0x38] sm:$0xff]  ;;  %v616_v32 = vld [vmem:[%s1875_s7 + $0x30] sm:$0xff]  ;;  %v479_v34 = vld [vmem:[%s1874_s6 + $0x48] sm:$0xff] }
   0xc   :  { %v1413_v33 = vld [vmem:[%s1869_s1 + $0x38] sm:$0xff]   ;;  %v478_v35 = vld [vmem:[%s1874_s6 + $0x40] sm:$0xff]  ;;  %v619_v38 = vld [vmem:[%s1875_s7 + $0x48] sm:$0xff] }
   0xd   :  { %1321 = vmatpush3.bf16.msra.mxu0 %v1403_v12  ;;  %v1414_v36 = vld [vmem:[%s1868_s0] ss:$8 sps:$4 sm:$0xff]   ;;  %v1417_v37 = vld [vmem:[%s1868_s0 + $0x14] ss:$8 sps:$4 sm:$0xff]   ;;  %v1419_v42 = vld [vmem:[%s1868_s0 + $0x10] ss:$8 sps:$4 sm:$0xff]  }
   0xe   :  { %1322 = vmatprep.subr.bf16.mxu0 %v1404_v13  ;;  %643 = vperm.xlu1 %1397, %v613_v14   ;;  %v618_v39 = vld [vmem:[%s1875_s7 + $0x40] sm:$0xff]  ;;  %v481_v40 = vld [vmem:[%s1874_s6 + $0x58] sm:$0xff]  ;;  %v480_v41 = vld [vmem:[%s1874_s6 + $0x50] sm:$0xff] }
   0xf   :  { %638 = vperm.xlu0 %1396, %v612_v15   ;;  %v1420_v43 = vld [vmem:[%s1868_s0 + $0x24] ss:$8 sps:$4 sm:$0xff]   ;;  %v621_v44 = vld [vmem:[%s1875_s7 + $0x58] sm:$0xff]  ;;  %v620_v45 = vld [vmem:[%s1875_s7 + $0x50] sm:$0xff] }
  0x10   :  { %v51_v46 = vld [vmem:[%s1868_s0 + $0x30] sm:$0xff]  ;;  %v483_v47 = vld [vmem:[%s1874_s6 + $0x68] sm:$0xff]  ;;  %v482_v48 = vld [vmem:[%s1874_s6 + $0x60] sm:$0xff] }
  0x11   :  { %1323 = vmatpush3.bf16.msra.mxu0 %v1405_v16  ;;  %v1422_v49 = vld [vmem:[%s1868_s0 + $0x20] ss:$8 sps:$4 sm:$0xff]  }
  0x12   :  { %1324 = vmatprep.subr.bf16.mxu0 %v1406_v17  ;;  %514 = vperm.xlu1 %1397, %v475_v18  }
  0x13   :  { %509 = vperm.xlu0 %1396, %v474_v19  }
  0x15   :  { %1325 = vmatpush3.bf16.msra.mxu0 %v1407_v20 }
  0x16   :  { %1326 = vmatprep.subr.bf16.mxu0 %v1408_v21  ;;  %653 = vperm.xlu1 %1397, %v615_v22  }
  0x17   :  { %648 = vperm.xlu0 %1396, %v614_v23  }
  0x19   :  { %1327 = vmatpush3.bf16.msra.mxu0 %v1409_v24 }
  0x1a   :  { %1328 = vmatprep.subr.bf16.mxu0 %v1410_v25  ;;  %524 = vperm.xlu1 %1397, %v477_v26  }
  0x1b   :  { %519 = vperm.xlu0 %1396, %v476_v27  }
  0x1d   :  { %1329 = vmatpush3.bf16.msra.mxu0 %v1411_v29 }
  0x1e   :  { %1330 = vmatprep.subr.bf16.mxu0 %v1412_v30  ;;  %663 = vperm.xlu1 %1397, %v617_v31  }
  0x1f   :  { %658 = vperm.xlu0 %1396, %v616_v32  }
  0x21   :  { %1331 = vmatpush3.bf16.msra.mxu0 %v1413_v33 }
  0x22   :  { %534 = vperm.xlu1 %1397, %v479_v34  }
  0x23   :  { %529 = vperm.xlu0 %1396, %v478_v35  }
  0x24   :  { %257 = vmatmul.mubr.bf16.vlgmr.msra.gmra.mrb[0].mxu0 %v1414_v36 }
  0x25   :  { %264 = vmatprep.mubr.bf16.mxu0 %v1417_v37 }
  0x26   :  { %673 = vperm.xlu1 %1397, %v619_v38  }
  0x27   :  { %668 = vperm.xlu0 %1396, %v618_v39  }
  0x2a   :  { %544 = vperm.xlu1 %1397, %v481_v40  }
  0x2b   :  { %539 = vperm.xlu0 %1396, %v480_v41  }
  0x2c   :  { %265 = vmatmul.mubr.bf16.gmra.mrb[4].mxu0 %v1419_v42 }
  0x2d   :  { %272 = vmatprep.mubr.bf16.mxu0 %v1420_v43 }
  0x2e   :  { %683 = vperm.xlu1 %1397, %v621_v44  }
  0x2f   :  { %678 = vperm.xlu0 %1396, %v620_v45  }
  0x30   :  { %17 = vsyncpa [#allocation5], 0  ;;  %v1247_v50 = vcombine.high %v51_v46, %v51_v46  ;;  %v623_v51 = vld [vmem:[%s1875_s7 + $0x68] sm:$0xff]  ;;  %v622_v52 = vld [vmem:[%s1875_s7 + $0x60] sm:$0xff]  ;;  %v1246_v55 = vcombine.low %v51_v46, %v51_v46  ;;  %v568_v14 = vlaneseq }
  0x31   :  { %v485_v53 = vld [vmem:[%s1874_s6 + $0x78] sm:$0xff]  ;;  %v484_v54 = vld [vmem:[%s1874_s6 + $0x70] sm:$0xff]  ;;  %v803_v58 = vld [vmem:[%s1877_s9 + $0x8] sm:$0xff] }
  0x32   :  { %554 = vperm.xlu1 %1397, %v483_v47   ;;  %v625_v56 = vld [vmem:[%s1875_s7 + $0x78] sm:$0xff]  ;;  %v624_v57 = vld [vmem:[%s1875_s7 + $0x70] sm:$0xff]  ;;  %v802_v59 = vld [vmem:[%s1877_s9] sm:$0xff]  ;;  %v569_v16 = vshrl.u32 %v568_v14, 7 }
  0x33   :  { %549 = vperm.xlu0 %1396, %v482_v48   ;;  %v805_v60 = vld [vmem:[%s1877_s9 + $0x18] sm:$0xff]  ;;  %v804_v61 = vld [vmem:[%s1877_s9 + $0x10] sm:$0xff]  ;;  %v807_v62 = vld [vmem:[%s1877_s9 + $0x28] sm:$0xff] }
  0x34   :  { %273 = vmatmul.mubr.bf16.gmra.mrb[8].mxu0 %v1422_v49  ;;  %v806_v63 = vld [vmem:[%s1877_s9 + $0x20] sm:$0xff]  ;;  %v809_v0 = vld [vmem:[%s1877_s9 + $0x38] sm:$0xff]  ;;  %v808_v1 = vld [vmem:[%s1877_s9 + $0x30] sm:$0xff]  ;;  %v570_v18 = vsub.s32 0, %v569_v16  ;;  %v574_v19 = vsub.s32 1, %v569_v16 }
  0x35   :  { %280 = vmatprep.mubr.bf16.mxu0 %v1247_v50  ;;  %v811_v3 = vld [vmem:[%s1877_s9 + $0x48] sm:$0xff]  ;;  %v810_v4 = vld [vmem:[%s1877_s9 + $0x40] sm:$0xff]  ;;  %v813_v5 = vld [vmem:[%s1877_s9 + $0x58] sm:$0xff] }
  0x36   :  { %693 = vperm.xlu1 %1397, %v623_v51   ;;  %v812_v6 = vld [vmem:[%s1877_s9 + $0x50] sm:$0xff]  ;;  %v815_v7 = vld [vmem:[%s1877_s9 + $0x68] sm:$0xff]  ;;  %v814_v8 = vld [vmem:[%s1877_s9 + $0x60] sm:$0xff] }
  0x37   :  { %688 = vperm.xlu0 %1396, %v622_v52   ;;  %v817_v9 = vld [vmem:[%s1877_s9 + $0x78] sm:$0xff]  ;;  %v816_v10 = vld [vmem:[%s1877_s9 + $0x70] sm:$0xff]  ;;  %v1430_v11 = vld [vmem:[%s1871_s3] sm:$0xff]  }
  0x38   :  { %v1431_v12 = vld [vmem:[%s1871_s3 + $0x8] sm:$0xff]   ;;  %1368 = vmatprep.subr.bf16.mxu1 %v1430_v11  ;;  %v1433_v13 = vld [vmem:[%s1871_s3 + $0x10] sm:$0xff]   ;;  %v1434_v15 = vld [vmem:[%s1871_s3 + $0x18] sm:$0xff]  }
  0x39   :  { %1369 = vmatpush3.bf16.msra.mxu1 %v1430_v11  ;;  %v1436_v17 = vld [vmem:[%s1871_s3 + $0x20] sm:$0xff]   ;;  %v1437_v21 = vld [vmem:[%s1871_s3 + $0x28] sm:$0xff]   ;;  %v1439_v24 = vld [vmem:[%s1871_s3 + $0x30] sm:$0xff]  }
  0x3a   :  { %564 = vperm.xlu1 %1397, %v485_v53   ;;  %1370 = vmatprep.subr.bf16.mxu1 %v1431_v12  ;;  %v486_v20 = vld [vmem:[%s1873_s5] sm:$0x3]  ;;  %v1440_v31 = vld [vmem:[%s1871_s3 + $0x38] sm:$0xff]  }
  0x3b   :  { %559 = vperm.xlu0 %1396, %v484_v54   ;;  %v1770_v22 = vrot.slane %v486_v20, %v570_v18  ;;  %v1772_v23 = vrot.slane %v486_v20, %v574_v19 }
  0x3c   :  { %281 = vmatmul.mubr.bf16.gmra.mrb[12].mxu0 %v1246_v55 }
  0x3d   :  { %978 = vmatprep.mubr.bf16.mxu0 %v1469_v2  ;;  %1371 = vmatpush3.bf16.msra.mxu1 %v1431_v12 }
  0x3e   :  { %703 = vperm.xlu1 %1397, %v625_v56   ;;  %1372 = vmatprep.subr.bf16.mxu1 %v1433_v13 }
  0x3f   :  { %698 = vperm.xlu0 %1396, %v624_v57  }
  0x41   :  { %1373 = vmatpush3.bf16.msra.mxu1 %v1433_v13 }
  0x42   :  { %825 = vperm.xlu1 %1397, %v803_v58   ;;  %1374 = vmatprep.subr.bf16.mxu1 %v1434_v15 }
  0x43   :  { %820 = vperm.xlu0 %1396, %v802_v59  }
  0x45   :  { %1375 = vmatpush3.bf16.msra.mxu1 %v1434_v15 }
  0x46   :  { %835 = vperm.xlu1 %1397, %v805_v60   ;;  %1376 = vmatprep.subr.bf16.mxu1 %v1436_v17 }
  0x47   :  { %830 = vperm.xlu0 %1396, %v804_v61  }
  0x49   :  { %1377 = vmatpush3.bf16.msra.mxu1 %v1436_v17 }
  0x4a   :  { %845 = vperm.xlu1 %1397, %v807_v62   ;;  %1378 = vmatprep.subr.bf16.mxu1 %v1437_v21 }
  0x4b   :  { %840 = vperm.xlu0 %1396, %v806_v63  }
  0x4d   :  { %1379 = vmatpush3.bf16.msra.mxu1 %v1437_v21 }
  0x4e   :  { %855 = vperm.xlu1 %1397, %v809_v0   ;;  %1380 = vmatprep.subr.bf16.mxu1 %v1439_v24 }
  0x4f   :  { %850 = vperm.xlu0 %1396, %v808_v1  }
  0x51   :  { %1381 = vmatpush3.bf16.msra.mxu1 %v1439_v24 }
  0x52   :  { %865 = vperm.xlu1 %1397, %v811_v3   ;;  %1382 = vmatprep.subr.bf16.mxu1 %v1440_v31 }
  0x53   :  { %860 = vperm.xlu0 %1396, %v810_v4  }
  0x55   :  { %1383 = vmatpush3.bf16.msra.mxu1 %v1440_v31 }
  0x56   :  { %875 = vperm.xlu1 %1397, %v813_v5  }
  0x57   :  { %870 = vperm.xlu0 %1396, %v812_v6  }
  0x5a   :  { %885 = vperm.xlu1 %1397, %v815_v7  }
  0x5b   :  { %880 = vperm.xlu0 %1396, %v814_v8  }
  0x5e   :  { %895 = vperm.xlu1 %1397, %v817_v9  }
  0x5f   :  { %890 = vperm.xlu0 %1396, %v816_v10  }
  0x81   :  { %v629_v25 = vpop.permute.xlu1 %628 }
  0x82   :  { %v490_v26 = vpop.permute.xlu0 %489 }
  0x83   :  { %v578_v27 = vmul.f32 %v1770_v22, %v490_v26  ;;  %v579_v28 = vmul.f32 %v1772_v23, %v490_v26 }
  0x85   :  { %v706_v29 = vadd.f32 %v629_v25, %v578_v27  ;;  %v707_v30 = vadd.f32 %v629_v25, %v579_v28  ;;  %v634_v32 = vpop.permute.xlu1 %633 }
  0x86   :  { %v495_v33 = vpop.permute.xlu0 %494 }
  0x87   :  { %v580_v34 = vmul.f32 %v1770_v22, %v495_v33  ;;  %v581_v35 = vmul.f32 %v1772_v23, %v495_v33  ;;  %v738_v36 = vmax.f32 %v706_v29, 0.0  ;;  %v739_v37 = vmax.f32 %v707_v30, 0.0 }
  0x89   :  { %v708_v38 = vadd.f32 %v634_v32, %v580_v34  ;;  %v709_v39 = vadd.f32 %v634_v32, %v581_v35  ;;  %v505_v40 = vpop.permute.xlu1 %504 }
  0x8a   :  { %v500_v41 = vpop.permute.xlu0 %499  ;;  %v584_v44 = vmul.f32 %v1770_v22, %v505_v40  ;;  %v585_v45 = vmul.f32 %v1772_v23, %v505_v40 }
  0x8b   :  { %v740_v42 = vmax.f32 %v708_v38, 0.0  ;;  %v741_v43 = vmax.f32 %v709_v39, 0.0  ;;  %v582_v46 = vmul.f32 %v1770_v22, %v500_v41  ;;  %v583_v47 = vmul.f32 %v1772_v23, %v500_v41 }
  0x8d   :  { %v786_v48 = vpack.c.bf16 %v740_v42, %v738_v36  ;;  %v787_v49 = vpack.c.bf16 %v741_v43, %v739_v37  ;;  %v644_v50 = vpop.permute.xlu1 %643 }
  0x8e   :  { %v639_v51 = vpop.permute.xlu0 %638  ;;  %v712_v52 = vadd.f32 %v644_v50, %v584_v44  ;;  %v713_v53 = vadd.f32 %v644_v50, %v585_v45 }
  0x8f   :  { %v710_v54 = vadd.f32 %v639_v51, %v582_v46  ;;  %v711_v55 = vadd.f32 %v639_v51, %v583_v47  ;;  %946 = vmatprep.subr.bf16.mxu0 %v787_v49 }
  0x90   :  { %947 = vmatpush1.bf16.msra.mxu0 %v786_v48  ;;  %v744_v56 = vmax.f32 %v712_v52, 0.0  ;;  %v745_v57 = vmax.f32 %v713_v53, 0.0 }
  0x91   :  { %v742_v58 = vmax.f32 %v710_v54, 0.0  ;;  %v743_v59 = vmax.f32 %v711_v55, 0.0  ;;  %v515_v60 = vpop.permute.xlu1 %514 }
  0x92   :  { %v510_v61 = vpop.permute.xlu0 %509  ;;  %v588_v0 = vmul.f32 %v1770_v22, %v515_v60  ;;  %v589_v1 = vmul.f32 %v1772_v23, %v515_v60 }
  0x93   :  { %v788_v62 = vpack.c.bf16 %v744_v56, %v742_v58  ;;  %v789_v63 = vpack.c.bf16 %v745_v57, %v743_v59  ;;  %v586_v3 = vmul.f32 %v1770_v22, %v510_v61  ;;  %v587_v4 = vmul.f32 %v1772_v23, %v510_v61 }
  0x95   :  { %948 = vmatprep.subr.bf16.mxu0 %v789_v63  ;;  %v654_v5 = vpop.permute.xlu1 %653 }
  0x96   :  { %v649_v6 = vpop.permute.xlu0 %648  ;;  %v716_v7 = vadd.f32 %v654_v5, %v588_v0  ;;  %v717_v8 = vadd.f32 %v654_v5, %v589_v1  ;;  %949 = vmatpush1.bf16.msra.mxu0 %v788_v62 }
  0x97   :  { %v714_v9 = vadd.f32 %v649_v6, %v586_v3  ;;  %v715_v10 = vadd.f32 %v649_v6, %v587_v4 }
  0x98   :  { %v748_v11 = vmax.f32 %v716_v7, 0.0  ;;  %v749_v12 = vmax.f32 %v717_v8, 0.0 }
  0x99   :  { %v746_v13 = vmax.f32 %v714_v9, 0.0  ;;  %v747_v14 = vmax.f32 %v715_v10, 0.0  ;;  %v525_v15 = vpop.permute.xlu1 %524 }
  0x9a   :  { %v520_v16 = vpop.permute.xlu0 %519  ;;  %v592_v19 = vmul.f32 %v1770_v22, %v525_v15  ;;  %v593_v20 = vmul.f32 %v1772_v23, %v525_v15 }
  0x9b   :  { %v790_v17 = vpack.c.bf16 %v748_v11, %v746_v13  ;;  %v791_v18 = vpack.c.bf16 %v749_v12, %v747_v14  ;;  %v590_v21 = vmul.f32 %v1770_v22, %v520_v16  ;;  %v591_v24 = vmul.f32 %v1772_v23, %v520_v16 }
  0x9d   :  { %950 = vmatprep.subr.bf16.mxu0 %v791_v18  ;;  %v664_v25 = vpop.permute.xlu1 %663 }
  0x9e   :  { %v659_v26 = vpop.permute.xlu0 %658  ;;  %v720_v27 = vadd.f32 %v664_v25, %v592_v19  ;;  %v721_v28 = vadd.f32 %v664_v25, %v593_v20  ;;  %951 = vmatpush1.bf16.msra.mxu0 %v790_v17 }
  0x9f   :  { %v718_v29 = vadd.f32 %v659_v26, %v590_v21  ;;  %v719_v30 = vadd.f32 %v659_v26, %v591_v24 }
  0xa0   :  { %v752_v31 = vmax.f32 %v720_v27, 0.0  ;;  %v753_v32 = vmax.f32 %v721_v28, 0.0 }
  0xa1   :  { %v750_v33 = vmax.f32 %v718_v29, 0.0  ;;  %v751_v34 = vmax.f32 %v719_v30, 0.0  ;;  %v535_v35 = vpop.permute.xlu1 %534 }
  0xa2   :  { %v530_v36 = vpop.permute.xlu0 %529  ;;  %v596_v39 = vmul.f32 %v1770_v22, %v535_v35  ;;  %v597_v40 = vmul.f32 %v1772_v23, %v535_v35 }
  0xa3   :  { %v792_v37 = vpack.c.bf16 %v752_v31, %v750_v33  ;;  %v793_v38 = vpack.c.bf16 %v753_v32, %v751_v34  ;;  %v594_v41 = vmul.f32 %v1770_v22, %v530_v36  ;;  %v595_v42 = vmul.f32 %v1772_v23, %v530_v36 }
  0xa5   :  { %952 = vmatprep.subr.bf16.mxu0 %v793_v38  ;;  %v674_v43 = vpop.permute.xlu1 %673 }
  0xa6   :  { %v669_v44 = vpop.permute.xlu0 %668  ;;  %v724_v45 = vadd.f32 %v674_v43, %v596_v39  ;;  %v725_v46 = vadd.f32 %v674_v43, %v597_v40  ;;  %953 = vmatpush1.bf16.msra.mxu0 %v792_v37 }
  0xa7   :  { %v722_v47 = vadd.f32 %v669_v44, %v594_v41  ;;  %v723_v48 = vadd.f32 %v669_v44, %v595_v42 }
  0xa8   :  { %v756_v49 = vmax.f32 %v724_v45, 0.0  ;;  %v757_v50 = vmax.f32 %v725_v46, 0.0 }
  0xa9   :  { %v754_v51 = vmax.f32 %v722_v47, 0.0  ;;  %v755_v52 = vmax.f32 %v723_v48, 0.0  ;;  %v545_v53 = vpop.permute.xlu1 %544  ;;  %v1427_v48 = vld [vmem:[%s1876_s8 + $0x10] sm:$0xff]  }
  0xaa   :  { %v540_v54 = vpop.permute.xlu0 %539  ;;  %v600_v57 = vmul.f32 %v1770_v22, %v545_v53  ;;  %v601_v58 = vmul.f32 %v1772_v23, %v545_v53 }
  0xab   :  { %v794_v55 = vpack.c.bf16 %v756_v49, %v754_v51  ;;  %v795_v56 = vpack.c.bf16 %v757_v50, %v755_v52  ;;  %v598_v59 = vmul.f32 %v1770_v22, %v540_v54  ;;  %v599_v60 = vmul.f32 %v1772_v23, %v540_v54  ;;  %v1428_v49 = vld [vmem:[%s1876_s8 + $0x18] sm:$0xff]   ;;  %v1429_v50 = vld [vmem:[%s1876_s8 + $0x20] sm:$0xff]   ;;  %v1432_v51 = vld [vmem:[%s1876_s8 + $0x28] sm:$0xff]  }
  0xac   :  { %v1435_v52 = vld [vmem:[%s1876_s8 + $0x30] sm:$0xff]  }
  0xad   :  { %954 = vmatprep.subr.bf16.mxu0 %v795_v56  ;;  %v684_v61 = vpop.permute.xlu1 %683 }
  0xae   :  { %v679_v62 = vpop.permute.xlu0 %678  ;;  %v728_v63 = vadd.f32 %v684_v61, %v600_v57  ;;  %v729_v0 = vadd.f32 %v684_v61, %v601_v58  ;;  %955 = vmatpush1.bf16.msra.mxu0 %v794_v55  ;;  %v1239_v55 = vld [vmem:[%s1870_s2] ss:$0 sm:$0xff]  ;;  %v1438_v61 = vld [vmem:[%s1876_s8 + $0x38] sm:$0xff]  }
  0xaf   :  { %v726_v1 = vadd.f32 %v679_v62, %v598_v59  ;;  %v727_v3 = vadd.f32 %v679_v62, %v599_v60 }
  0xb0   :  { %v760_v4 = vmax.f32 %v728_v63, 0.0  ;;  %v761_v5 = vmax.f32 %v729_v0, 0.0 }
  0xb1   :  { %v758_v6 = vmax.f32 %v726_v1, 0.0  ;;  %v759_v7 = vmax.f32 %v727_v3, 0.0  ;;  %v555_v8 = vpop.permute.xlu1 %554 }
  0xb2   :  { %v550_v9 = vpop.permute.xlu0 %549  ;;  %v604_v12 = vmul.f32 %v1770_v22, %v555_v8  ;;  %v605_v13 = vmul.f32 %v1772_v23, %v555_v8 }
  0xb3   :  { %v796_v10 = vpack.c.bf16 %v760_v4, %v758_v6  ;;  %v797_v11 = vpack.c.bf16 %v761_v5, %v759_v7  ;;  %v602_v14 = vmul.f32 %v1770_v22, %v550_v9  ;;  %v603_v15 = vmul.f32 %v1772_v23, %v550_v9 }
  0xb5   :  { %956 = vmatprep.subr.bf16.mxu0 %v797_v11  ;;  %v694_v16 = vpop.permute.xlu1 %693 }
  0xb6   :  { %v689_v17 = vpop.permute.xlu0 %688  ;;  %v732_v18 = vadd.f32 %v694_v16, %v604_v12  ;;  %v733_v19 = vadd.f32 %v694_v16, %v605_v13  ;;  %957 = vmatpush1.bf16.msra.mxu0 %v796_v10 }
  0xb7   :  { %v730_v20 = vadd.f32 %v689_v17, %v602_v14  ;;  %v731_v21 = vadd.f32 %v689_v17, %v603_v15 }
  0xb8   :  { %v764_v24 = vmax.f32 %v732_v18, 0.0  ;;  %v765_v25 = vmax.f32 %v733_v19, 0.0 }
  0xb9   :  { %v762_v26 = vmax.f32 %v730_v20, 0.0  ;;  %v763_v27 = vmax.f32 %v731_v21, 0.0  ;;  %v565_v28 = vpop.permute.xlu1 %564 }
  0xba   :  { %v560_v29 = vpop.permute.xlu0 %559  ;;  %v608_v32 = vmul.f32 %v1770_v22, %v565_v28  ;;  %v609_v33 = vmul.f32 %v1772_v23, %v565_v28 }
  0xbb   :  { %v798_v30 = vpack.c.bf16 %v764_v24, %v762_v26  ;;  %v799_v31 = vpack.c.bf16 %v765_v25, %v763_v27  ;;  %v606_v34 = vmul.f32 %v1770_v22, %v560_v29  ;;  %v607_v35 = vmul.f32 %v1772_v23, %v560_v29  ;;  %v1425_v22 = vld [vmem:[%s1876_s8] sm:$0xff]   ;;  %v1426_v23 = vld [vmem:[%s1876_s8 + $0x8] sm:$0xff]  }
  0xbd   :  { %958 = vmatprep.subr.bf16.mxu0 %v799_v31  ;;  %v704_v36 = vpop.permute.xlu1 %703 }
  0xbe   :  { %v699_v37 = vpop.permute.xlu0 %698  ;;  %v736_v38 = vadd.f32 %v704_v36, %v608_v32  ;;  %v737_v39 = vadd.f32 %v704_v36, %v609_v33  ;;  %959 = vmatpush1.bf16.msra.mxu0 %v798_v30 }
  0xbf   :  { %v734_v40 = vadd.f32 %v699_v37, %v606_v34  ;;  %v735_v41 = vadd.f32 %v699_v37, %v607_v35 }
  0xc0   :  { %v768_v42 = vmax.f32 %v736_v38, 0.0  ;;  %v769_v43 = vmax.f32 %v737_v39, 0.0 }
  0xc1   :  { %v766_v44 = vmax.f32 %v734_v40, 0.0  ;;  %v767_v45 = vmax.f32 %v735_v41, 0.0  ;;  %v826_v39 = vpop.permute.xlu1 %825 }
  0xc2   :  { %v821_v35 = vpop.permute.xlu0 %820 }
  0xc3   :  { %v800_v46 = vpack.c.bf16 %v768_v42, %v766_v44  ;;  %v801_v47 = vpack.c.bf16 %v769_v43, %v767_v45 }
  0xc5   :  { %960 = vmatprep.subr.bf16.mxu0 %v801_v47 }
  0xc6   :  { %961 = vmatpush1.bf16.msra.mxu0 %v800_v46 }
  0xc9   :  { %979 = vmatmul.mubr.bf16.vlgmr.msra.gmra.mrb[16].mxu0 %v1425_v22 }
  0xca   :  { %988 = vmatprep.mubr.bf16.mxu0 %v1469_v2 }
  0xd1   :  { %989 = vmatmul.mubr.bf16.gmra.mrb[20].mxu0 %v1426_v23 }
  0xd2   :  { %998 = vmatprep.mubr.bf16.mxu0 %v1469_v2 }
  0xd9   :  { %999 = vmatmul.mubr.bf16.gmra.mrb[24].mxu0 %v1427_v48  ;;  %v831_v48 = vpop.permute.xlu0 %830 }
  0xda   :  { %1008 = vmatprep.mubr.bf16.mxu0 %v1469_v2 }
  0xe1   :  { %1009 = vmatmul.mubr.bf16.gmra.mrb[28].mxu0 %v1428_v49 }
  0xe2   :  { %1018 = vmatprep.mubr.bf16.mxu0 %v1469_v2 }
  0xe9   :  { %1019 = vmatmul.mubr.bf16.gmra.mrb[32].mxu0 %v1429_v50 }
  0xea   :  { %1028 = vmatprep.mubr.bf16.mxu0 %v1469_v2 }
  0xf1   :  { %1029 = vmatmul.mubr.bf16.gmra.mrb[36].mxu0 %v1432_v51 }
  0xf2   :  { %1038 = vmatprep.mubr.bf16.mxu0 %v1469_v2 }
  0xf7   :  { %v1332_v53 = vpop.f32.mrb[0].mxu0 }
  0xf8   :  { %v1333_v54 = vpop.f32.mrb[1].mxu0 }
  0xf9   :  { %v1334_v56 = vadd.f32 %v1333_v54, %v1332_v53  ;;  %v1335_v57 = vpop.f32.mrb[2].mxu0  ;;  %1039 = vmatmul.mubr.bf16.gmra.mrb[40].mxu0 %v1435_v52  ;;  %v836_v53 = vpop.permute.xlu1 %835 }
  0xfa   :  { %v1336_v58 = vpop.f32.mrb[3].mxu0  ;;  %1048 = vmatprep.mubr.bf16.mxu0 %v1469_v2 }
  0xfb   :  { %v1337_v59 = vadd.f32 %v1336_v58, %v1335_v57  ;;  %v259_v60 = vadd.f32 %v1334_v56, %v1239_v55 }
  0xfd   :  { %v262_v62 = vadd.f32 %v1337_v59, %v1239_v55  ;;  %v288_v0 = vmax.f32 %v259_v60, 0.0 }
  0xff   :  { %v1338_v63 = vpop.f32.mrb[4].mxu0  ;;  %v289_v1 = vmax.f32 %v262_v62, 0.0 }
 0x100   :  { %v1339_v3 = vpop.f32.mrb[5].mxu0 }
 0x101   :  { %v1340_v4 = vadd.f32 %v1339_v3, %v1338_v63  ;;  %v1341_v5 = vpop.f32.mrb[6].mxu0  ;;  %1049 = vmatmul.mubr.bf16.gmra.mrb[44].mxu0 %v1438_v61  ;;  %v295_v6 = vpack.c.bf16 %v289_v1, %v288_v0  ;;  %v841_v0 = vpop.permute.xlu0 %840 }
 0x102   :  { %v1342_v7 = vpop.f32.mrb[7].mxu0 }
 0x103   :  { %v267_v8 = vadd.f32 %v1340_v4, %v1239_v55  ;;  %v1343_v9 = vadd.f32 %v1342_v7, %v1341_v5  ;;  %1384 = vmatprep.mubr.bf16.mxu1 %v295_v6  ;;  %v846_v6 = vpop.permute.xlu1 %845 }
 0x105   :  { %v270_v10 = vadd.f32 %v1343_v9, %v1239_v55  ;;  %v290_v11 = vmax.f32 %v267_v8, 0.0 }
 0x107   :  { %v291_v12 = vmax.f32 %v270_v10, 0.0  ;;  %v1344_v13 = vpop.f32.mrb[8].mxu0 }
 0x108   :  { %v1345_v14 = vpop.f32.mrb[9].mxu0 }
 0x109   :  { %v1346_v15 = vadd.f32 %v1345_v14, %v1344_v13  ;;  %v1347_v16 = vpop.f32.mrb[10].mxu0  ;;  %v296_v17 = vpack.c.bf16 %v291_v12, %v290_v11 }
 0x10a   :  { %v1348_v18 = vpop.f32.mrb[11].mxu0 }
 0x10b   :  { %v275_v19 = vadd.f32 %v1346_v15, %v1239_v55  ;;  %v1349_v20 = vadd.f32 %v1348_v18, %v1347_v16  ;;  %1385 = vmatmul.mubr.bf16.vlgmr.msra.gmra.mrb[0].mxu1 %v296_v17  ;;  %v851_v17 = vpop.permute.xlu0 %850 }
 0x10d   :  { %v292_v21 = vmax.f32 %v275_v19, 0.0  ;;  %v278_v24 = vadd.f32 %v1349_v20, %v1239_v55 }
 0x10f   :  { %v293_v25 = vmax.f32 %v278_v24, 0.0  ;;  %v1350_v26 = vpop.f32.mrb[12].mxu0  ;;  %v856_v24 = vpop.permute.xlu1 %855 }
 0x110   :  { %v1351_v27 = vpop.f32.mrb[13].mxu0 }
 0x111   :  { %v1352_v28 = vadd.f32 %v1351_v27, %v1350_v26  ;;  %v1353_v29 = vpop.f32.mrb[14].mxu0  ;;  %v297_v30 = vpack.c.bf16 %v293_v25, %v292_v21 }
 0x112   :  { %v1354_v31 = vpop.f32.mrb[15].mxu0 }
 0x113   :  { %v283_v32 = vadd.f32 %v1352_v28, %v1239_v55  ;;  %1388 = vmatprep.mubr.bf16.mxu1 %v297_v30 }
 0x115   :  { %v294_v33 = vmax.f32 %v283_v32, 0.0 }
 0x117   :  { %v298_v34 = vpack.c.bf16 %v294_v33, %v294_v33 }
 0x119   :  { %1389 = vmatmul.mubr.bf16.gmra.mrb[4].mxu1 %v298_v34 }
 0x11a   :  { %1170 = vmatprep.mubr.bf16.mxu1 %v1469_v2 }
 0x19c   :  { %v980_v36 = vpop.f32.mrb[16].mxu0 }
 0x19d   :  { %v981_v37 = vadd.f32 %v980_v36, %v821_v35  ;;  %v982_v38 = vpop.f32.mrb[17].mxu0 }
 0x19e   :  { %v983_v40 = vadd.f32 %v982_v38, %v821_v35  ;;  %v984_v41 = vpop.f32.mrb[18].mxu0  ;;  %v861_v35 = vpop.permute.xlu0 %860 }
 0x19f   :  { %v985_v42 = vadd.f32 %v984_v41, %v826_v39  ;;  %v986_v43 = vpop.f32.mrb[19].mxu0  ;;  %v1059_v45 = vmax.f32 %v981_v37, 0.0 }
 0x1a0   :  { %v987_v44 = vadd.f32 %v986_v43, %v826_v39  ;;  %v1060_v47 = vmax.f32 %v983_v40, 0.0  ;;  %v866_v40 = vpop.permute.xlu1 %865 }
 0x1a1   :  { %v1061_v46 = vmax.f32 %v985_v42, 0.0 }
 0x1a2   :  { %v1062_v22 = vmax.f32 %v987_v44, 0.0 }
 0x1a3   :  { %v1098_v23 = vpack.c.bf16 %v1061_v46, %v1059_v45 }
 0x1a4   :  { %v1099_v49 = vpack.c.bf16 %v1062_v22, %v1060_v47  ;;  %v990_v50 = vpop.f32.mrb[20].mxu0 }
 0x1a5   :  { %v991_v51 = vadd.f32 %v990_v50, %v831_v48  ;;  %v992_v52 = vpop.f32.mrb[21].mxu0 }
 0x1a6   :  { %v993_v54 = vadd.f32 %v992_v52, %v831_v48  ;;  %v994_v55 = vpop.f32.mrb[22].mxu0  ;;  %1138 = vmatprep.subr.bf16.mxu1 %v1099_v49  ;;  %v871_v49 = vpop.permute.xlu0 %870 }
 0x1a7   :  { %v995_v56 = vadd.f32 %v994_v55, %v836_v53  ;;  %v996_v57 = vpop.f32.mrb[23].mxu0  ;;  %1139 = vmatpush1.bf16.msra.mxu1 %v1098_v23  ;;  %v1063_v59 = vmax.f32 %v991_v51, 0.0 }
 0x1a8   :  { %v997_v58 = vadd.f32 %v996_v57, %v836_v53  ;;  %v1064_v61 = vmax.f32 %v993_v54, 0.0  ;;  %v876_v54 = vpop.permute.xlu1 %875 }
 0x1a9   :  { %v1065_v60 = vmax.f32 %v995_v56, 0.0 }
 0x1aa   :  { %v1066_v62 = vmax.f32 %v997_v58, 0.0 }
 0x1ab   :  { %v1100_v63 = vpack.c.bf16 %v1065_v60, %v1063_v59 }
 0x1ac   :  { %v1101_v1 = vpack.c.bf16 %v1066_v62, %v1064_v61  ;;  %v1000_v3 = vpop.f32.mrb[24].mxu0 }
 0x1ad   :  { %v1001_v4 = vadd.f32 %v1000_v3, %v841_v0  ;;  %v1002_v5 = vpop.f32.mrb[25].mxu0 }
 0x1ae   :  { %v1003_v7 = vadd.f32 %v1002_v5, %v841_v0  ;;  %v1004_v8 = vpop.f32.mrb[26].mxu0  ;;  %1140 = vmatprep.subr.bf16.mxu1 %v1101_v1  ;;  %v881_v1 = vpop.permute.xlu0 %880 }
 0x1af   :  { %v1005_v9 = vadd.f32 %v1004_v8, %v846_v6  ;;  %v1006_v10 = vpop.f32.mrb[27].mxu0  ;;  %1141 = vmatpush1.bf16.msra.mxu1 %v1100_v63  ;;  %v1067_v12 = vmax.f32 %v1001_v4, 0.0 }
 0x1b0   :  { %v1007_v11 = vadd.f32 %v1006_v10, %v846_v6  ;;  %v1068_v14 = vmax.f32 %v1003_v7, 0.0  ;;  %v886_v7 = vpop.permute.xlu1 %885 }
 0x1b1   :  { %v1069_v13 = vmax.f32 %v1005_v9, 0.0 }
 0x1b2   :  { %v1070_v15 = vmax.f32 %v1007_v11, 0.0 }
 0x1b3   :  { %v1102_v16 = vpack.c.bf16 %v1069_v13, %v1067_v12 }
 0x1b4   :  { %v1103_v18 = vpack.c.bf16 %v1070_v15, %v1068_v14  ;;  %v1010_v19 = vpop.f32.mrb[28].mxu0 }
 0x1b5   :  { %v1011_v20 = vadd.f32 %v1010_v19, %v851_v17  ;;  %v1012_v21 = vpop.f32.mrb[29].mxu0 }
 0x1b6   :  { %v1013_v25 = vadd.f32 %v1012_v21, %v851_v17  ;;  %v1014_v26 = vpop.f32.mrb[30].mxu0  ;;  %1142 = vmatprep.subr.bf16.mxu1 %v1103_v18  ;;  %v891_v18 = vpop.permute.xlu0 %890 }
 0x1b7   :  { %v1015_v27 = vadd.f32 %v1014_v26, %v856_v24  ;;  %v1016_v28 = vpop.f32.mrb[31].mxu0  ;;  %1143 = vmatpush1.bf16.msra.mxu1 %v1102_v16  ;;  %v1071_v30 = vmax.f32 %v1011_v20, 0.0 }
 0x1b8   :  { %v1017_v29 = vadd.f32 %v1016_v28, %v856_v24  ;;  %v1072_v32 = vmax.f32 %v1013_v25, 0.0  ;;  %v896_v25 = vpop.permute.xlu1 %895 }
 0x1b9   :  { %v1073_v31 = vmax.f32 %v1015_v27, 0.0 }
 0x1ba   :  { %v1074_v33 = vmax.f32 %v1017_v29, 0.0 }
 0x1bb   :  { %v1104_v34 = vpack.c.bf16 %v1073_v31, %v1071_v30 }
 0x1bc   :  { %v1105_v36 = vpack.c.bf16 %v1074_v33, %v1072_v32  ;;  %v1020_v37 = vpop.f32.mrb[32].mxu0 }
 0x1bd   :  { %v1021_v38 = vadd.f32 %v1020_v37, %v861_v35  ;;  %v1022_v39 = vpop.f32.mrb[33].mxu0 }
 0x1be   :  { %v1023_v41 = vadd.f32 %v1022_v39, %v861_v35  ;;  %v1024_v42 = vpop.f32.mrb[34].mxu0  ;;  %1144 = vmatprep.subr.bf16.mxu1 %v1105_v36 }
 0x1bf   :  { %v1025_v43 = vadd.f32 %v1024_v42, %v866_v40  ;;  %v1026_v44 = vpop.f32.mrb[35].mxu0  ;;  %1145 = vmatpush1.bf16.msra.mxu1 %v1104_v34  ;;  %v1075_v46 = vmax.f32 %v1021_v38, 0.0  ;;  %v1264_v38 = vld [vmem:[%s1872_s4] ss:$0 sm:$0xff] }
 0x1c0   :  { %v1027_v45 = vadd.f32 %v1026_v44, %v866_v40  ;;  %v1076_v22 = vmax.f32 %v1023_v41, 0.0 }
 0x1c1   :  { %v1077_v47 = vmax.f32 %v1025_v43, 0.0 }
 0x1c2   :  { %v1078_v23 = vmax.f32 %v1027_v45, 0.0 }
 0x1c3   :  { %v1106_v48 = vpack.c.bf16 %v1077_v47, %v1075_v46 }
 0x1c4   :  { %v1107_v50 = vpack.c.bf16 %v1078_v23, %v1076_v22  ;;  %v1030_v51 = vpop.f32.mrb[36].mxu0 }
 0x1c5   :  { %v1031_v52 = vadd.f32 %v1030_v51, %v871_v49  ;;  %v1032_v53 = vpop.f32.mrb[37].mxu0 }
 0x1c6   :  { %v1033_v55 = vadd.f32 %v1032_v53, %v871_v49  ;;  %v1034_v56 = vpop.f32.mrb[38].mxu0  ;;  %1146 = vmatprep.subr.bf16.mxu1 %v1107_v50 }
 0x1c7   :  { %v1035_v57 = vadd.f32 %v1034_v56, %v876_v54  ;;  %v1036_v58 = vpop.f32.mrb[39].mxu0  ;;  %1147 = vmatpush1.bf16.msra.mxu1 %v1106_v48  ;;  %v1079_v60 = vmax.f32 %v1031_v52, 0.0 }
 0x1c8   :  { %v1037_v59 = vadd.f32 %v1036_v58, %v876_v54  ;;  %v1080_v62 = vmax.f32 %v1033_v55, 0.0 }
 0x1c9   :  { %v1081_v61 = vmax.f32 %v1035_v57, 0.0 }
 0x1ca   :  { %v1082_v63 = vmax.f32 %v1037_v59, 0.0  ;;  %v1115_v59 = vstv %s1878_s10  ;;  %s1470_s10 = smov [#allocation4]  }
 0x1cb   :  { %v1108_v0 = vpack.c.bf16 %v1081_v61, %v1079_v60  ;;  %s1228_s25 = sshll.u32 %s1470_s10, 4  ;;  %s1229_s25 = int_to_ptr.vmem [resolvable:$true] %s1228_s25 }
 0x1cc   :  { %v1109_v3 = vpack.c.bf16 %v1082_v63, %v1080_v62  ;;  %v1040_v4 = vpop.f32.mrb[40].mxu0  ;;  %s1445_s26 = scalar_lea.vmem %s1229_s25, 1792  ;;  %p1450_p1 = scmp.lt.s32.totalorder %s1229_s25, %s1229_s25 }
 0x1cd   :  { %v1041_v5 = vadd.f32 %v1040_v4, %v881_v1  ;;  %v1042_v6 = vpop.f32.mrb[41].mxu0  ;;  %p1446_p0 = scmp.ne.s32.totalorder %s1229_s25, %s1445_s26  ;;  %p1451_p2 = scmp.lt.s32.totalorder %s1445_s26, %s1445_s26 }
 0x1ce   :  { %v1043_v8 = vadd.f32 %v1042_v6, %v881_v1  ;;  %v1044_v9 = vpop.f32.mrb[42].mxu0  ;;  %1148 = vmatprep.subr.bf16.mxu1 %v1109_v3 }
 0x1cf   :  { %v1045_v10 = vadd.f32 %v1044_v9, %v886_v7  ;;  %v1046_v11 = vpop.f32.mrb[43].mxu0  ;;  %1149 = vmatpush1.bf16.msra.mxu1 %v1108_v0  ;;  %v1083_v13 = vmax.f32 %v1041_v5, 0.0  ;;  %p1452_p3 = por %p1451_p2, %p1450_p1 }
 0x1d0   :  { %v1047_v12 = vadd.f32 %v1046_v11, %v886_v7  ;;  %v1084_v15 = vmax.f32 %v1043_v8, 0.0 }
 0x1d1   :  { %v1085_v14 = vmax.f32 %v1045_v10, 0.0  ;;  %p1453_p4 = pnand %p1452_p3, %p1446_p0 }
 0x1d2   :  { %v1086_v16 = vmax.f32 %v1047_v12, 0.0 }
 0x1d3   :  { %v1110_v17 = vpack.c.bf16 %v1085_v14, %v1083_v13 }
 0x1d4   :  { %v1111_v19 = vpack.c.bf16 %v1086_v16, %v1084_v15  ;;  %v1050_v20 = vpop.f32.mrb[44].mxu0 }
 0x1d5   :  { %v1051_v21 = vadd.f32 %v1050_v20, %v891_v18  ;;  %v1052_v24 = vpop.f32.mrb[45].mxu0 }
 0x1d6   :  { %v1053_v26 = vadd.f32 %v1052_v24, %v891_v18  ;;  %v1054_v27 = vpop.f32.mrb[46].mxu0  ;;  %1150 = vmatprep.subr.bf16.mxu1 %v1111_v19 }
 0x1d7   :  { %v1055_v28 = vadd.f32 %v1054_v27, %v896_v25  ;;  %v1056_v29 = vpop.f32.mrb[47].mxu0  ;;  %1151 = vmatpush1.bf16.msra.mxu1 %v1110_v17  ;;  %v1087_v31 = vmax.f32 %v1051_v21, 0.0 }
 0x1d8   :  { %v1057_v30 = vadd.f32 %v1056_v29, %v896_v25  ;;  %v1088_v33 = vmax.f32 %v1053_v26, 0.0 }
 0x1d9   :  { %v1089_v32 = vmax.f32 %v1055_v28, 0.0 }
 0x1da   :  { %v1090_v34 = vmax.f32 %v1057_v30, 0.0 }
 0x1db   :  { %v1112_v35 = vpack.c.bf16 %v1089_v32, %v1087_v31 }
 0x1dc   :  { %v1113_v36 = vpack.c.bf16 %v1090_v34, %v1088_v33 }
 0x1de   :  { %v1386_v37 = vpop.f32.mrb[0].mxu1  ;;  %1152 = vmatprep.subr.bf16.mxu1 %v1113_v36 }
 0x1df   :  { %v404_v39 = vpop.f32.mrb[1].mxu1  ;;  %1153 = vmatpush1.bf16.msra.mxu1 %v1112_v35  ;;  %v413_v41 = vadd.f32 %v1386_v37, %v1264_v38 }
 0x1e0   :  { %v1387_v40 = vpop.f32.mrb[2].mxu1  ;;  %v405_v44 = vadd.f32 %v1264_v38, %v404_v39 }
 0x1e1   :  { %v416_v42 = vadd.f32 %v1387_v40, %v1264_v38  ;;  %v407_v43 = vpop.f32.mrb[3].mxu1 }
 0x1e2   :  { %v408_v45 = vadd.f32 %v1264_v38, %v407_v43 }
 0x1e3   :  { %v1307_v46 = vpack.c.bf16 %v416_v42, %v413_v41 }
 0x1e4   :  { %v1302_v47 = vpack.c.bf16 %v408_v45, %v405_v44 }
 0x1e5   :  { %1314 = vst [vmem:[#allocation2 + $0x8] sm:$0xff] %v1307_v46  }
 0x1e6   :  { %1303 = vst [vmem:[#allocation2] sm:$0xff] %v1302_v47  }
 0x1ec   :  { %v1390_v22 = vpop.f32.mrb[4].mxu1  ;;  %v1442_v56 = vld [vmem:[#allocation2 + $0x8] sm:$0xff]  }
 0x1ed   :  { %v429_v23 = vadd.f32 %v1390_v22, %v1264_v38  ;;  %v420_v48 = vpop.f32.mrb[5].mxu1  ;;  %v1441_v49 = vld [vmem:[#allocation2] sm:$0xff]  }
 0x1ee   :  { %v1391_v50 = vpop.f32.mrb[6].mxu1  ;;  %1171 = vmatmul.mubr.bf16.vlgmr.msra.gmra.mrb[8].mxu1 %v1441_v49  ;;  %v421_v53 = vadd.f32 %v1264_v38, %v420_v48 }
 0x1ef   :  { %v1298_v51 = vpack.c.bf16 %v429_v23, %v429_v23  ;;  %v423_v52 = vpop.f32.mrb[7].mxu1  ;;  %1180 = vmatprep.mubr.bf16.mxu1 %v1469_v2 }
 0x1f0   :  { %v424_v54 = vadd.f32 %v1264_v38, %v423_v52 }
 0x1f1   :  { %469 = vst [vmem:[#allocation2 + $0x18] sm:$0xf] %v1298_v51 }
 0x1f2   :  { %v1312_v55 = vpack.c.bf16 %v424_v54, %v421_v53 }
 0x1f4   :  { %1315 = vst [vmem:[#allocation2 + $0x10] sm:$0xff] %v1312_v55  }
 0x1f6   :  { %1181 = vmatmul.mubr.bf16.gmra.mrb[12].mxu1 %v1442_v56 }
 0x1f7   :  { %1190 = vmatprep.mubr.bf16.mxu1 %v1469_v2 }
 0x1f8   :  { %v1444_v58 = vld [vmem:[#allocation2 + $0x18] ss:$0 sps:$4 sm:$0xff]  }
 0x1fb   :  { %v1443_v57 = vld [vmem:[#allocation2 + $0x10] sm:$0xff]  }
 0x1fe   :  { %1191 = vmatmul.mubr.bf16.gmra.mrb[16].mxu1 %v1443_v57 }
 0x1ff   :  { %1200 = vmatprep.mubr.bf16.mxu1 %v1469_v2 }
 0x206   :  { %1201 = vmatmul.mubr.bf16.gmra.mrb[20].mxu1 %v1444_v58 }
 0x2c1   :  { %v1172_v60 = vpop.f32.mrb[8].mxu1 }
 0x2c2   :  { %v1173_v61 = vadd.f32 %v1172_v60, %v1115_v59  ;;  %v1174_v62 = vpop.f32.mrb[9].mxu1 }
 0x2c3   :  { %v1175_v63 = vadd.f32 %v1174_v62, %v1115_v59  ;;  %v1176_v0 = vpop.f32.mrb[10].mxu1 }
 0x2c4   :  { %1209 = vst [vmem:[#allocation4] sm:$0xff] %v1173_v61  ;;  %v1177_v1 = vadd.f32 %v1176_v0, %v1115_v59  ;;  %v1178_v3 = vpop.f32.mrb[11].mxu1 }
 0x2c5   :  { %1210 = vst [vmem:[#allocation4 + $0x8] sm:$0xff] %v1175_v63  ;;  %v1179_v4 = vadd.f32 %v1178_v3, %v1115_v59 }
 0x2c6   :  { %1211 = vst [vmem:[#allocation4 + $0x10] sm:$0xff] %v1177_v1 }
 0x2c7   :  { %1212 = vst [vmem:[#allocation4 + $0x18] sm:$0xff] %v1179_v4 }
 0x2c9   :  { %v1182_v5 = vpop.f32.mrb[12].mxu1 }
 0x2ca   :  { %v1183_v2 = vadd.f32 %v1182_v5, %v1115_v59  ;;  %v1184_v6 = vpop.f32.mrb[13].mxu1 }
 0x2cb   :  { %v1185_v7 = vadd.f32 %v1184_v6, %v1115_v59  ;;  %v1186_v8 = vpop.f32.mrb[14].mxu1 }
 0x2cc   :  { %1213 = vst [vmem:[#allocation4 + $0x20] sm:$0xff] %v1183_v2  ;;  %v1187_v9 = vadd.f32 %v1186_v8, %v1115_v59  ;;  %v1188_v10 = vpop.f32.mrb[15].mxu1 }
 0x2cd   :  { %1214 = vst [vmem:[#allocation4 + $0x28] sm:$0xff] %v1185_v7  ;;  %v1189_v11 = vadd.f32 %v1188_v10, %v1115_v59 }
 0x2ce   :  { %1215 = vst [vmem:[#allocation4 + $0x30] sm:$0xff] %v1187_v9 }
 0x2cf   :  { %1216 = vst [vmem:[#allocation4 + $0x38] sm:$0xff] %v1189_v11 }
 0x2d1   :  { %v1192_v12 = vpop.f32.mrb[16].mxu1 }
 0x2d2   :  { %v1193_v13 = vadd.f32 %v1192_v12, %v1115_v59  ;;  %v1194_v14 = vpop.f32.mrb[17].mxu1 }
 0x2d3   :  { %v1195_v15 = vadd.f32 %v1194_v14, %v1115_v59  ;;  %v1196_v16 = vpop.f32.mrb[18].mxu1 }
 0x2d4   :  { %1217 = vst [vmem:[#allocation4 + $0x40] sm:$0xff] %v1193_v13  ;;  %v1197_v17 = vadd.f32 %v1196_v16, %v1115_v59  ;;  %v1198_v18 = vpop.f32.mrb[19].mxu1 }
 0x2d5   :  { %1218 = vst [vmem:[#allocation4 + $0x48] sm:$0xff] %v1195_v15  ;;  %v1199_v19 = vadd.f32 %v1198_v18, %v1115_v59 }
 0x2d6   :  { %1219 = vst [vmem:[#allocation4 + $0x50] sm:$0xff] %v1197_v17 }
 0x2d7   :  { %1220 = vst [vmem:[#allocation4 + $0x58] sm:$0xff] %v1199_v19 }
 0x2d9   :  { %v1202_v20 = vpop.f32.mrb[20].mxu1 }
 0x2da   :  { %v1203_v21 = vadd.f32 %v1202_v20, %v1115_v59  ;;  %v1204_v24 = vpop.f32.mrb[21].mxu1 }
 0x2db   :  { %v1205_v25 = vadd.f32 %v1204_v24, %v1115_v59  ;;  %v1206_v26 = vpop.f32.mrb[22].mxu1 }
 0x2dc   :  { %1221 = vst [vmem:[#allocation4 + $0x60] sm:$0xff] %v1203_v21  ;;  %v1207_v27 = vpop.f32.mrb[23].mxu1 }
 0x2dd   :  { %1222 = vst [vmem:[#allocation4 + $0x68] sm:$0xff] %v1205_v25 }
 0x2de   :  { %1456 = shalt.err (!%p1453_p4)
}
 0x2df   :  { %s1457_s29 = scalar_lea.hbm %s1879_s11, 1792 }
 0x2e0   :  { %p1458_p5 = scmp.ne.s32.totalorder %s1879_s11, %s1457_s29  ;;  %p1461_p6 = scmp.lt.u32.totalorder %s1457_s29, %s1879_s11 }
 0x2e2   :  { %p1463_p7 = pnand %p1461_p6, %p1458_p5 }
 0x2e4   :  { %1466 = shalt.err (!%p1463_p7)
}
 0x2e5   :  { %s1471_s12 = smov 256   ;;  %s1472_s13 = smov 16  }
 0x2e6   :  { %1234 = dma.vmem_to_hbm [thread:$0]  %s1229_s25, 1792, %s1879_s11, [#allocation5], %s1471_s12, %s1471_s12, %s1472_s13  }
 0x2e7   :  { %1467 = dma.done.wait [#allocation5], 1792  }
 0x2e8   :  { %1468 = vsyncadd [#allocation5], 4294965504 }
 0x2e9   :  { %1238 = vsyncpa [#allocation5], 1 }

</bundles_post_ra>
